<compile_context>
chip_gen: v6e
topology: v6e:2x2x1
jax: 0.10.0
libtpu: 0.0.40
codegen_flags: <defaults>
</compile_context>

<pallas_src>
import functools

import jax
import jax.numpy as jnp
from jax.experimental import pallas as pl
from jax.experimental.pallas import tpu as pltpu


MAX_TILE_B = 2048  # upper bound on the batch (lane) tile; multiple of 128


def _coupling_kernel(in_ref, w1_ref, w2_ref, w3_ref, out_ref, *, c_in, reverse):
    """One batch tile.  Layout is (features, batch); all refs live in VMEM.

    in_ref rows: [0:c_in] = z^T, [c_in] = ones (bias carrier),
                 [c_in+1] = ldj (forward only).
    """
    slab = in_ref[...]                         # (rows, TB), float32
    x = slab[:c_in + 1, :]                     # z rows + ones row
    z = slab[:c_in, :]                         # f32 pass-through for the epilogue

    # 3-layer MLP, transposed: h^T = W' @ x'^T.  Biases ride in the last
    # column of each W' via the ones row; mask already folded into W1'/W3'.
    h = jnp.maximum(
        jnp.dot(w1_ref[...], x.astype(w1_ref.dtype),
                preferred_element_type=jnp.float32), 0.0)   # (n_hidden+1, TB)
    h = jnp.maximum(
        jnp.dot(w2_ref[...], h.astype(w2_ref.dtype),
                preferred_element_type=jnp.float32), 0.0)   # (n_hidden+1, TB)
    st = jnp.dot(w3_ref[...], h.astype(w3_ref.dtype),
                 preferred_element_type=jnp.float32)        # (2*c_in, TB)

    # Rows of W3'/b3 belonging to mask==1 channels were zeroed at prep time, so
    # tanh(s) and t are exactly zero there -> no `* (1 - mask)` needed.
    log_scale = jnp.tanh(st[:c_in, :])
    t = st[c_in:, :]

    if not reverse:
        out_ref[:c_in, :] = jnp.exp(log_scale) * (z + t)
        out_ref[c_in:, :] = slab[c_in + 1:c_in + 2, :] + jnp.sum(
            log_scale, axis=0, keepdims=True)
    else:
        out_ref[...] = jnp.exp(-log_scale) * z - t


def prep_params(params, mask, compute_dtype=jnp.float32):
    """Fold mask and all biases into three augmented weight matrices.

    PyTorch layout: w* is (out, in).  NOTE: the mask folding (zeroing W3/b3
    rows so tanh(0)=0 replaces the post-tanh `*(1-mask)`) is exact only for
    binary {0, 1} masks.

      w1a: (n_hidden+1, c_in+1)     [[W1*mask, b1], [0, 1]]   (last row passes ones)
      w2a: (n_hidden+1, n_hidden+1) [[W2,      b2], [0, 1]]
      w3a: (2*c_in,     n_hidden+1) [(1-mask)-kept rows of W3 | (1-mask)*b3]
    """
    w1, b1, w2, b2, w3, b3 = params
    n_hidden, c_in = w1.shape
    keep = jnp.concatenate([1.0 - mask, 1.0 - mask])[:, None]   # (2*c_in, 1)

    w1a = jnp.zeros((n_hidden + 1, c_in + 1), jnp.float32)
    w1a = w1a.at[:n_hidden, :c_in].set(w1 * mask[None, :])      # fold `z * mask`
    w1a = w1a.at[:n_hidden, c_in].set(b1)                       # fold b1
    w1a = w1a.at[n_hidden, c_in].set(1.0)                       # carry the ones row

    w2a = jnp.zeros((n_hidden + 1, n_hidden + 1), jnp.float32)
    w2a = w2a.at[:n_hidden, :n_hidden].set(w2)
    w2a = w2a.at[:n_hidden, n_hidden].set(b2)                   # fold b2
    w2a = w2a.at[n_hidden, n_hidden].set(1.0)                   # carry the ones row

    w3a = jnp.concatenate([w3 * keep, (b3[:, None] * keep)], axis=1)  # fold (1-mask), b3

    return (w1a.astype(compute_dtype), w2a.astype(compute_dtype),
            w3a.astype(compute_dtype))


def _choose_tile_b(B, max_tile=MAX_TILE_B, min_steps=2):
    """Wide lane tile, but keep >= min_steps grid steps (v7x two-TC split)."""
    b128 = pl.cdiv(B, 128) * 128
    return int(min(max_tile, max(128, (b128 // min_steps // 128) * 128)))


@functools.partial(jax.jit, static_argnames=("reverse", "compute_dtype", "tile_b"))
def coupling_forward(z, ldj, mask, params, reverse=False,
                     compute_dtype=jnp.float32, tile_b=None):
    """Pallas Coupling.forward.  z: (B, c_in) f32, ldj: (B,) f32, mask: (c_in,)."""
    B, c_in = z.shape
    if tile_b is None:
        tile_b = _choose_tile_b(B)
    assert tile_b % 128 == 0

    n_tiles = pl.cdiv(B, tile_b)
    b_pad = n_tiles * tile_b

    w1a, w2a, w3a = prep_params(params, mask, compute_dtype)
    n_hidden = w1a.shape[0] - 1

    in_rows = c_in + 1 if reverse else c_in + 2     # + ones row (+ ldj row fwd)
    out_rows = c_in if reverse else c_in + 1        # (+ ldj row fwd)

    # Build the streamed slab (skip the pad when B is already a tile multiple).
    zT = z.T.astype(jnp.float32)
    if b_pad == B:
        parts = [zT, jnp.ones((1, B), jnp.float32)]
        if not reverse:
            parts.append(ldj.reshape(1, B).astype(jnp.float32))
        slab = jnp.concatenate(parts, axis=0)
    else:
        slab = jnp.zeros((in_rows, b_pad), jnp.float32)
        slab = slab.at[:c_in, :B].set(zT)
        slab = slab.at[c_in, :].set(1.0)
        if not reverse:
            slab = slab.at[c_in + 1, :B].set(ldj)

    def stream_spec(rows):                 # streamed along the batch (lane) axis
        return pl.BlockSpec((rows, tile_b), lambda i: (0, i))

    def const_spec(arr):                   # resident in VMEM across all tiles
        return pl.BlockSpec(arr.shape, lambda i: (0, 0))

    flops = 2 * b_pad * ((c_in + 1) * (n_hidden + 1)
                         + (n_hidden + 1) * (n_hidden + 1)
                         + (n_hidden + 1) * 2 * c_in) + 10 * b_pad * c_in
    bytes_accessed = (slab.size * 4 + b_pad * out_rows * 4
                      + sum(a.size * a.dtype.itemsize for a in (w1a, w2a, w3a)))
    cost = pl.CostEstimate(flops=flops, transcendentals=2 * b_pad * c_in,
                           bytes_accessed=bytes_accessed)

    out = pl.pallas_call(
        functools.partial(_coupling_kernel, c_in=c_in, reverse=reverse),
        grid=(n_tiles,),
        in_specs=[stream_spec(in_rows),
                  const_spec(w1a), const_spec(w2a), const_spec(w3a)],
        out_specs=pl.BlockSpec((out_rows, tile_b), lambda i: (0, i)),
        out_shape=jax.ShapeDtypeStruct((out_rows, b_pad), jnp.float32),
        compiler_params=pltpu.CompilerParams(
            dimension_semantics=("parallel",)),   # megacore / v7x 2-TC split
        cost_estimate=cost,
    )(slab, w1a, w2a, w3a)

    z_out = out[:c_in, :B].T
    if reverse:
        return z_out, ldj                   # PyTorch: reverse leaves ldj untouched
    return z_out, out[c_in, :B]


def coupling_reference(z, ldj, mask, params, reverse=False):
    """Pure-JAX float32 reference mirroring the PyTorch forward exactly."""
    w1, b1, w2, b2, w3, b3 = params          # PyTorch layout: (out, in)
    h = jnp.maximum(jnp.dot(z * mask, w1.T) + b1, 0.0)
    h = jnp.maximum(jnp.dot(h, w2.T) + b2, 0.0)
    st = jnp.dot(h, w3.T) + b3
    c = z.shape[-1]
    s, t = st[:, :c], st[:, c:]
    log_scale = jnp.tanh(s) * (1.0 - mask)
    t = t * (1.0 - mask)
    if not reverse:
        z = jnp.exp(log_scale) * (z + t)
        ldj = ldj + jnp.sum(log_scale, axis=-1)
    else:
        z = jnp.exp(-log_scale) * z - t
    return z, ldj


def make_params(key, c_in, n_hidden):
    """Deterministic synthetic parameters, PyTorch (out, in) weight layout.

    NOTE: the PyTorch module zero-inits the last Linear (identity coupling);
    here we use small nonzero values so the kernel math is actually exercised.
    """
    k1, k2, k3, k4 = jax.random.split(key, 4)
    w1 = 0.1 * jax.random.normal(k1, (n_hidden, c_in), jnp.float32)
    b1 = 0.01 * jnp.ones((n_hidden,), jnp.float32)
    w2 = 0.1 * jax.random.normal(k2, (n_hidden, n_hidden), jnp.float32)
    b2 = 0.01 * jnp.ones((n_hidden,), jnp.float32)
    w3 = 0.05 * jax.random.normal(k3, (2 * c_in, n_hidden), jnp.float32)
    b3 = 0.02 * jax.random.normal(k4, (2 * c_in,), jnp.float32)
    return (w1, b1, w2, b2, w3, b3)


if __name__ == "__main__":
    B, c_in, n_hidden = 512, 4, 32          # -> 2 batch tiles of 256 lanes

    key = jax.random.PRNGKey(0)
    kz, kp = jax.random.split(key)
    z = jax.random.normal(kz, (B, c_in), jnp.float32)
    ldj = jnp.zeros((B,), jnp.float32)
    mask = (jnp.arange(c_in) % 2).astype(jnp.float32)   # binary alternating mask
    params = make_params(kp, c_in, n_hidden)

    # float32 forward (reverse=False)
    z_fwd, ldj_fwd = coupling_forward(z, ldj, mask, params, reverse=False)
    jax.block_until_ready((z_fwd, ldj_fwd))
    z_ref, ldj_ref = coupling_reference(z, ldj, mask, params, reverse=False)

    # float32 inverse (reverse=True); ldj bypasses the kernel entirely
    z_rev, ldj_rev = coupling_forward(z_fwd, ldj_fwd, mask, params, reverse=True)
    jax.block_until_ready((z_rev, ldj_rev))
    z_rev_ref, _ = coupling_reference(z_fwd, ldj_fwd, mask, params, reverse=True)

    assert jnp.allclose(z_fwd, z_ref, atol=1e-5, rtol=1e-5)
    assert jnp.allclose(ldj_fwd, ldj_ref, atol=1e-5, rtol=1e-5)
    assert jnp.allclose(z_rev, z_rev_ref, atol=1e-5, rtol=1e-5)
    assert jnp.allclose(z_rev, z, atol=1e-4, rtol=1e-4)   # coupling is invertible
    assert jnp.allclose(ldj_rev, ldj_fwd)                 # reverse leaves ldj alone

    # bf16 MXU-operand path (v6e/v7x): f32 z streaming, f32 accum + f32 epilogue
    z_bf, ldj_bf = coupling_forward(z, ldj, mask, params, reverse=False,
                                    compute_dtype=jnp.bfloat16)
    jax.block_until_ready((z_bf, ldj_bf))
    assert jnp.allclose(z_bf, z_ref, atol=3e-2, rtol=3e-2)
    assert jnp.allclose(ldj_bf, ldj_ref, atol=3e-2, rtol=3e-2)

    print("KERNEL_OK")
</pallas_src>

<mosaic_0001>
module attributes {stable_mosaic.version = 11 : i64} {
  func.func @_coupling_kernel(%arg0: i32, %arg1: memref<6x256xf32, #tpu.memory_space<vmem>>, %arg2: memref<33x5xf32, #tpu.memory_space<vmem>>, %arg3: memref<33x33xf32, #tpu.memory_space<vmem>>, %arg4: memref<8x33xf32, #tpu.memory_space<vmem>>, %arg5: memref<5x256xf32, #tpu.memory_space<vmem>>) attributes {dimension_semantics = [#tpu.dimension_semantics<parallel>], iteration_bounds = array<i64: 2>, scalar_prefetch = 0 : i64, scratch_operands = 0 : i64, tpu.core_type = #tpu.core_type<tc>, window_params = [{transform_indices = @transform_0, window_bounds = array<i64: 6, 256>}, {pipeline_mode = #tpu.pipeline_mode<synchronous>, transform_indices = @transform_1, window_bounds = array<i64: 33, 5>}, {pipeline_mode = #tpu.pipeline_mode<synchronous>, transform_indices = @transform_2, window_bounds = array<i64: 33, 33>}, {pipeline_mode = #tpu.pipeline_mode<synchronous>, transform_indices = @transform_3, window_bounds = array<i64: 8, 33>}, {transform_indices = @transform_4, window_bounds = array<i64: 5, 256>}]} {
    %c0 = arith.constant 0 : index
    %c0_0 = arith.constant 0 : index
    %0 = vector.load %arg1[%c0, %c0_0] : memref<6x256xf32, #tpu.memory_space<vmem>>, vector<6x256xf32>
    %1 = vector.extract_strided_slice %0 {offsets = [0, 0], sizes = [5, 256], strides = [1, 1]} : vector<6x256xf32> to vector<5x256xf32>
    %2 = vector.extract_strided_slice %0 {offsets = [0, 0], sizes = [4, 256], strides = [1, 1]} : vector<6x256xf32> to vector<4x256xf32>
    %c0_1 = arith.constant 0 : index
    %c0_2 = arith.constant 0 : index
    %3 = vector.load %arg2[%c0_1, %c0_2] : memref<33x5xf32, #tpu.memory_space<vmem>>, vector<33x5xf32>
    %cst = arith.constant dense<0.000000e+00> : vector<33x256xf32>
    %4 = tpu.matmul %3, %1, %cst {dimension_numbers = #tpu.dot_dimension_numbers<[1], [0], [0], [1], [0, 0, 1, 1], [], []>} : vector<33x5xf32>, vector<5x256xf32>, vector<33x256xf32> -> vector<33x256xf32>
    %cst_3 = arith.constant 0.000000e+00 : f32
    %5 = vector.broadcast %cst_3 : f32 to vector<33x256xf32>
    %6 = arith.maximumf %4, %5 : vector<33x256xf32>
    %c0_4 = arith.constant 0 : index
    %c0_5 = arith.constant 0 : index
    %7 = vector.load %arg3[%c0_4, %c0_5] : memref<33x33xf32, #tpu.memory_space<vmem>>, vector<33x33xf32>
    %cst_6 = arith.constant dense<0.000000e+00> : vector<33x256xf32>
    %8 = tpu.matmul %7, %6, %cst_6 {dimension_numbers = #tpu.dot_dimension_numbers<[1], [0], [0], [1], [0, 0, 1, 1], [], []>} : vector<33x33xf32>, vector<33x256xf32>, vector<33x256xf32> -> vector<33x256xf32>
    %cst_7 = arith.constant 0.000000e+00 : f32
    %9 = vector.broadcast %cst_7 : f32 to vector<33x256xf32>
    %10 = arith.maximumf %8, %9 : vector<33x256xf32>
    %c0_8 = arith.constant 0 : index
    %c0_9 = arith.constant 0 : index
    %11 = vector.load %arg4[%c0_8, %c0_9] : memref<8x33xf32, #tpu.memory_space<vmem>>, vector<8x33xf32>
    %cst_10 = arith.constant dense<0.000000e+00> : vector<8x256xf32>
    %12 = tpu.matmul %11, %10, %cst_10 {dimension_numbers = #tpu.dot_dimension_numbers<[1], [0], [0], [1], [0, 0, 1, 1], [], []>} : vector<8x33xf32>, vector<33x256xf32>, vector<8x256xf32> -> vector<8x256xf32>
    %13 = vector.extract_strided_slice %12 {offsets = [0, 0], sizes = [4, 256], strides = [1, 1]} : vector<8x256xf32> to vector<4x256xf32>
    %14 = math.tanh %13 : vector<4x256xf32>
    %15 = vector.extract_strided_slice %12 {offsets = [4, 0], sizes = [4, 256], strides = [1, 1]} : vector<8x256xf32> to vector<4x256xf32>
    %16 = math.exp %14 : vector<4x256xf32>
    %17 = arith.addf %2, %15 : vector<4x256xf32>
    %18 = arith.mulf %16, %17 : vector<4x256xf32>
    %c0_11 = arith.constant 0 : index
    %c0_12 = arith.constant 0 : index
    %19 = vector.load %arg5[%c0_11, %c0_12] : memref<5x256xf32, #tpu.memory_space<vmem>>, vector<4x256xf32>
    tpu.vector_store %arg5[%c0_11, %c0_12], %18 {strides = array<i32>} : memref<5x256xf32, #tpu.memory_space<vmem>>, vector<4x256xf32>,
    %20 = vector.extract_strided_slice %0 {offsets = [5, 0], sizes = [1, 256], strides = [1, 1]} : vector<6x256xf32> to vector<1x256xf32>
    %cst_13 = arith.constant dense<0.000000e+00> : vector<256xf32>
    %21 = vector.multi_reduction <add>, %14, %cst_13 [0] : vector<4x256xf32> to vector<256xf32>
    %22 = vector.shape_cast %21 : vector<256xf32> to vector<1x256xf32>
    %23 = arith.addf %20, %22 : vector<1x256xf32>
    %c4 = arith.constant 4 : index
    %c0_14 = arith.constant 0 : index
    %24 = vector.load %arg5[%c4, %c0_14] : memref<5x256xf32, #tpu.memory_space<vmem>>, vector<1x256xf32>
    tpu.vector_store %arg5[%c4, %c0_14], %23 {strides = array<i32>} : memref<5x256xf32, #tpu.memory_space<vmem>>, vector<1x256xf32>,
    return
  }
  func.func @transform_0(%arg0: i32) -> (i32, i32) {
    %c0_i32 = arith.constant 0 : i32
    %c0_i32_0 = arith.constant 0 : i32
    return %c0_i32, %arg0 : i32, i32
  }
  func.func @transform_1(%arg0: i32) -> (i32, i32) {
    %c0_i32 = arith.constant 0 : i32
    %c0_i32_0 = arith.constant 0 : i32
    %c0_i32_1 = arith.constant 0 : i32
    return %c0_i32, %c0_i32_0 : i32, i32
  }
  func.func @transform_2(%arg0: i32) -> (i32, i32) {
    %c0_i32 = arith.constant 0 : i32
    %c0_i32_0 = arith.constant 0 : i32
    %c0_i32_1 = arith.constant 0 : i32
    return %c0_i32, %c0_i32_0 : i32, i32
  }
  func.func @transform_3(%arg0: i32) -> (i32, i32) {
    %c0_i32 = arith.constant 0 : i32
    %c0_i32_0 = arith.constant 0 : i32
    %c0_i32_1 = arith.constant 0 : i32
    return %c0_i32, %c0_i32_0 : i32, i32
  }
  func.func @transform_4(%arg0: i32) -> (i32, i32) {
    %c0_i32 = arith.constant 0 : i32
    %c0_i32_0 = arith.constant 0 : i32
    return %c0_i32, %arg0 : i32, i32
  }
}

</mosaic_0001>

<bundles_post_ra>
// kernel: coupling_forward.1
= control target key start
LH: loop header
LB: loop body
LE: loop exit
PB: predicated region body
PF: predicated region fallthrough
CT: control target
= control target key end

     0   :  { %s749_s15 = smov 0   ;;  %s837_s0 = inlined_call_operand.vmem [shape: f32[6,512], index: 0, kind: input, shape index: {}]   ;;  %s838_s1 = inlined_call_operand.vmem [shape: f32[33,5], index: 1, kind: input, shape index: {}]   ;;  %s839_s2 = inlined_call_operand.vmem [shape: f32[33,33], index: 2, kind: input, shape index: {}]   ;;  %s840_s3 = inlined_call_operand.vmem [shape: f32[8,33], index: 3, kind: input, shape index: {}]   ;;  %s841_s4 = inlined_call_operand.vmem [shape: f32[5,512], index: 4, kind: output, shape index: {}]  }
   0x1 LB: > { %s667_s16 = sadd.s32 4294967295, %s720_s15   ;;  %p671_p0 = scmp.ge.s32.totalorder %s720_s15, 1  ;;  %s720_s15 = sphi %s749_s15, %s14_s15  }
   0x2   : > { %p163_p1 = scmp.lt.s32.totalorder %s720_s15, 3 }
   0x4   : > { %p164_p2 = pnand %p671_p0, %p163_p1 }
   0x5   : > { %s672_s17 = sshll.u32 (!%p164_p2), %s667_s16, 1 }
   0x6   : > { %167 = sbr.rel (%p164_p2) target bundleno = 696 (0x2b8), region = 36  ;;  %p190_p3 = scmp.lt.s32.totalorder (!%p164_p2), %s672_s17, 3 }
   0xb   : > { %v722_v0 = vmov 0.0   ;;  %s843_s17 = smov (!%p190_p3, %s672_s17), 3  ;;  %vm224_vm0 = vcmask 1044480   ;;  %v203_v3 = vld [vmem:[%s838_s1] sm:$0xff]  ;;  %vm208_vm1 = vcmask 39936   ;;  %v204_v4 = vld [vmem:[%s838_s1 + $0x8] sm:$0xff] }
   0xc   : > { %295 = vmatprep.mubr.f32.mxu0 %v722_v0  ;;  %428 = vmatprep.mubr.f32.mxu1 %v722_v0  ;;  %s673_s18 = sshll.u32 %s843_s17, 3  ;;  %v205_v5 = vld [vmem:[%s838_s1 + $0x10] sm:$0xff]  ;;  %v206_v6 = vld [vmem:[%s838_s1 + $0x18] sm:$0xff]  ;;  %v207_v7 = vld [vmem:[%s838_s1 + $0x20] sm:$0x1]  ;;  %vm357_vm2 = vcmask 1040384  }
   0xd   : > { %s193_s21 = scalar_lea.vmem %s837_s0, %s673_s18  ;;  %v336_v28 = vld [vmem:[%s839_s2] sm:$0xff]  ;;  %vm341_vm3 = vcmask 269312   ;;  %v337_v29 = vld [vmem:[%s839_s2 + $0x8] sm:$0xff]  ;;  %v338_v30 = vld [vmem:[%s839_s2 + $0x10] sm:$0xff]  ;;  %vm568_vm4 = vcmask 1043456   ;;  %s199_s23 = scalar_lea.vmem %s841_s4, %s673_s18 }
   0xe   : > { %v767_v1 = vld [vmem:[%s193_s21 + $0x8] sm:$0x3f]  ;;  %v769_v2 = vld [vmem:[%s193_s21] sm:$0x3f]  ;;  %v339_v31 = vld [vmem:[%s839_s2 + $0x18] sm:$0xff] }
   0xf   : > { %676 = vmatprep.subr.msk.mxu0 %vm224_vm0, %v767_v1  ;;  %v340_v32 = vld [vmem:[%s839_s2 + $0x20] sm:$0x1] }
  0x10   : > { %677 = vmatpush1.msk.msra.mxu0 %vm224_vm0, %v769_v2  ;;  %v469_v53 = vld [vmem:[%s840_s3] sm:$0xff] }
  0x11   : > { %678 = vmatmul.mubr.msk.f32.vlgmr.msra.gmra.mxu0 %vm208_vm1, %v203_v3 }
  0x12   : > { %301 = vmatprep.mubr.f32.mxu0 %v722_v0 }
  0x15   : > { %679 = vmatmul.mubr.msk.f32.gmra.mxu0 %vm208_vm1, %v204_v4 }
  0x16   : > { %307 = vmatprep.mubr.f32.mxu0 %v722_v0 }
  0x19   : > { %680 = vmatmul.mubr.msk.f32.gmra.mxu0 %vm208_vm1, %v205_v5 }
  0x1a   : > { %313 = vmatprep.mubr.f32.mxu0 %v722_v0 }
  0x1d   : > { %681 = vmatmul.mubr.msk.f32.gmra.mxu0 %vm208_vm1, %v206_v6 }
  0x1e   : > { %319 = vmatprep.mubr.f32.mxu0 %v722_v0 }
  0x21   : > { %682 = vmatmul.mubr.msk.f32.gmra.mxu0 %vm208_vm1, %v207_v7  ;;  %v723_v7 = vmov 1966171168  }
  0x22   : > { %543 = vmatprep.mubr.f32.mxu0 %v722_v0 }
  0xd1   : > { %v297_v8 = vpop.f32.mrf.mxu0 }
  0xd2   : > { %v326_v27 = vmax.f32 %v297_v8, 0.0  ;;  %v589_v8 = vunpack.c.l.s4 %v723_v7 }
  0xd3   : > { %v299_v9 = vpop.f32.mrf.mxu0 }
  0xd4   : > { %v327_v26 = vmax.f32 %v299_v9, 0.0  ;;  %v591_v9 = vlaneseq }
  0xd5   : > { %v303_v10 = vpop.f32.mrf.mxu0 }
  0xd6   : > { %v328_v25 = vmax.f32 %v303_v10, 0.0  ;;  %vm606_vm5 = vcmp.lt.s32.totalorder %v591_v9, 256 }
  0xd7   : > { %v305_v11 = vpop.f32.mrf.mxu0 }
  0xd8   : > { %v329_v24 = vmax.f32 %v305_v11, 0.0 }
  0xd9   : > { %v309_v12 = vpop.f32.mrf.mxu0 }
  0xda   : > { %v330_v23 = vmax.f32 %v309_v12, 0.0 }
  0xdb   : > { %v311_v13 = vpop.f32.mrf.mxu0 }
  0xdc   : > { %v331_v22 = vmax.f32 %v311_v13, 0.0 }
  0xdd   : > { %v315_v14 = vpop.f32.mrf.mxu0 }
  0xde   : > { %v332_v21 = vmax.f32 %v315_v14, 0.0 }
  0xdf   : > { %v317_v15 = vpop.f32.mrf.mxu0 }
  0xe0   : > { %v333_v20 = vmax.f32 %v317_v15, 0.0  ;;  %v590_v15 = vunpack.c.0.s8 %v589_v8 }
  0xe1   : > { %v321_v16 = vpop.f32.mrf.mxu0 }
  0xe2   : > { %v334_v19 = vmax.f32 %v321_v16, 0.0  ;;  %v592_v16 = vshrl.u32 %v591_v9, 7 }
  0xe3   : > { %v323_v17 = vpop.f32.mrf.mxu0 }
  0xe4   : > { %v335_v18 = vmax.f32 %v323_v17, 0.0 }
  0xe6   : > { %683 = vmatprep.subr.msk.mxu1 %vm357_vm2, %v335_v18 }
  0xe7   : > { %684 = vmatpush1.msk.msra.mxu1 %vm357_vm2, %v334_v19 }
  0xe8   : > { %388 = vmatprep.subr.mxu1 %v333_v20 }
  0xe9   : > { %389 = vmatpush1.msra.mxu1 %v332_v21 }
  0xea   : > { %390 = vmatprep.subr.mxu1 %v331_v22 }
  0xeb   : > { %391 = vmatpush1.msra.mxu1 %v330_v23  ;;  %v593_v23 = vsub.s32 %v590_v15, %v592_v16 }
  0xec   : > { %392 = vmatprep.subr.mxu1 %v329_v24 }
  0xed   : > { %393 = vmatpush1.msra.mxu1 %v328_v25 }
  0xee   : > { %394 = vmatprep.subr.mxu1 %v327_v26 }
  0xef   : > { %395 = vmatpush1.msra.mxu1 %v326_v27 }
  0xf0   : > { %685 = vmatmul.mubr.msk.f32.vlgmr.msra.gmra.mxu1 %vm341_vm3, %v336_v28 }
  0xf1   : > { %434 = vmatprep.mubr.f32.mxu1 %v722_v0 }
  0xf4   : > { %686 = vmatmul.mubr.msk.f32.gmra.mxu1 %vm341_vm3, %v337_v29 }
  0xf5   : > { %440 = vmatprep.mubr.f32.mxu1 %v722_v0 }
  0xf8   : > { %687 = vmatmul.mubr.msk.f32.gmra.mxu1 %vm341_vm3, %v338_v30 }
  0xf9   : > { %446 = vmatprep.mubr.f32.mxu1 %v722_v0 }
  0xfc   : > { %688 = vmatmul.mubr.msk.f32.gmra.mxu1 %vm341_vm3, %v339_v31 }
  0xfd   : > { %452 = vmatprep.mubr.f32.mxu1 %v722_v0 }
 0x100   : > { %689 = vmatmul.mubr.msk.f32.gmra.mxu1 %vm341_vm3, %v340_v32 }
 0x1b0   : > { %v430_v33 = vpop.f32.mrf.mxu1 }
 0x1b1   : > { %v459_v52 = vmax.f32 %v430_v33, 0.0 }
 0x1b2   : > { %v432_v34 = vpop.f32.mrf.mxu1 }
 0x1b3   : > { %v460_v51 = vmax.f32 %v432_v34, 0.0 }
 0x1b4   : > { %v436_v35 = vpop.f32.mrf.mxu1 }
 0x1b5   : > { %v461_v50 = vmax.f32 %v436_v35, 0.0 }
 0x1b6   : > { %v438_v36 = vpop.f32.mrf.mxu1 }
 0x1b7   : > { %v462_v49 = vmax.f32 %v438_v36, 0.0 }
 0x1b8   : > { %v442_v37 = vpop.f32.mrf.mxu1 }
 0x1b9   : > { %v463_v48 = vmax.f32 %v442_v37, 0.0 }
 0x1ba   : > { %v444_v38 = vpop.f32.mrf.mxu1 }
 0x1bb   : > { %v464_v47 = vmax.f32 %v444_v38, 0.0 }
 0x1bc   : > { %v448_v39 = vpop.f32.mrf.mxu1 }
 0x1bd   : > { %v465_v46 = vmax.f32 %v448_v39, 0.0 }
 0x1be   : > { %v450_v40 = vpop.f32.mrf.mxu1 }
 0x1bf   : > { %v466_v45 = vmax.f32 %v450_v40, 0.0 }
 0x1c0   : > { %v454_v41 = vpop.f32.mrf.mxu1 }
 0x1c1   : > { %v467_v44 = vmax.f32 %v454_v41, 0.0 }
 0x1c2   : > { %v456_v42 = vpop.f32.mrf.mxu1 }
 0x1c3   : > { %v468_v43 = vmax.f32 %v456_v42, 0.0 }
 0x1c5   : > { %690 = vmatprep.subr.msk.mxu0 %vm357_vm2, %v468_v43 }
 0x1c6   : > { %691 = vmatpush1.msk.msra.mxu0 %vm357_vm2, %v467_v44 }
 0x1c7   : > { %503 = vmatprep.subr.mxu0 %v466_v45 }
 0x1c8   : > { %504 = vmatpush1.msra.mxu0 %v465_v46 }
 0x1c9   : > { %505 = vmatprep.subr.mxu0 %v464_v47 }
 0x1ca   : > { %506 = vmatpush1.msra.mxu0 %v463_v48 }
 0x1cb   : > { %507 = vmatprep.subr.mxu0 %v462_v49 }
 0x1cc   : > { %508 = vmatpush1.msra.mxu0 %v461_v50 }
 0x1cd   : > { %509 = vmatprep.subr.mxu0 %v460_v51 }
 0x1ce   : > { %510 = vmatpush1.msra.mxu0 %v459_v52 }
 0x1cf   : > { %692 = vmatmul.mubr.msk.f32.vlgmr.msra.gmra.mxu0 %vm341_vm3, %v469_v53 }
 0x28f   : > { %v545_v54 = vpop.f32.mrf.mxu0 }
 0x290   : > { %706 = vtanh.f32 %v545_v54  ;;  %v558_v12 = vrot.slane %v545_v54, 4 }
 0x291   : > { %v547_v55 = vpop.f32.mrf.mxu0 }
 0x292   : > { %708 = vtanh.f32 %v547_v55  ;;  %v559_v17 = vrot.slane %v547_v55, 4  ;;  %v562_v19 = vadd.f32 %v558_v12, %v769_v2 }
 0x294   : > { %v563_v25 = vadd.f32 %v559_v17, %v767_v1 }
 0x29d   : > { %v707_v56 = vpop.eup %706 }
 0x29e   : > { %v552_v57 = vmul.f32 1.442695, %v707_v56  ;;  %v569_v58 = vsel %vm568_vm4, %v707_v56, 0.0 }
 0x29f   : > { %v709_v59 = vpop.eup %708  ;;  %v570_v60 = vrot.slane %v569_v58, 4 }
 0x2a0   : > { %710 = vpow2.f32 %v552_v57  ;;  %v554_v61 = vmul.f32 1.442695, %v709_v59  ;;  %v576_v62 = vsel %vm568_vm4, %v709_v59, 0.0 }
 0x2a1   : > { %v571_v63 = vadd.f32 %v570_v60, %v569_v58  ;;  %v577_v0 = vrot.slane %v576_v62, 4 }
 0x2a2   : > { %712 = vpow2.f32 %v554_v61 }
 0x2a3   : > { %v572_v3 = vrot.slane %v571_v63, 2  ;;  %v578_v4 = vadd.f32 %v577_v0, %v576_v62 }
 0x2a5   : > { %v573_v5 = vadd.f32 %v572_v3, %v571_v63  ;;  %v579_v6 = vrot.slane %v578_v4, 2 }
 0x2a7   : > { %v574_v10 = vrot.slane %v573_v5, 1  ;;  %v580_v11 = vadd.f32 %v579_v6, %v578_v4 }
 0x2a9   : > { %v575_v13 = vadd.f32 %v574_v10, %v573_v5  ;;  %v581_v14 = vrot.slane %v580_v11, 1 }
 0x2ab   : > { %v582_v18 = vadd.f32 %v581_v14, %v580_v11  ;;  %v583_v21 = vadd.f32 %v575_v13, %v769_v2 }
 0x2ad   : > { %v711_v20 = vpop.eup %710  ;;  %v584_v22 = vadd.f32 %v582_v18, %v767_v1 }
 0x2ae   : > { %v564_v24 = vmul.f32 %v711_v20, %v562_v19 }
 0x2af   : > { %v713_v26 = vpop.eup %712  ;;  %v587_v27 = vcombine.high %v583_v21, %v584_v22 }
 0x2b0   : > { %566 = vst [vmem:[%s199_s23] sm:$0xf] %v564_v24  ;;  %v565_v28 = vmul.f32 %v713_v26, %v563_v25 }
 0x2b1   : > { %v594_v29 = vrot.slane %v587_v27, %v593_v23 }
 0x2b2   : > { %567 = vst [vmem:[%s199_s23 + $0x8] sm:$0xf] %v565_v28 }
 0x2b3   : > { %v595_v30 = vcombine.high %v594_v29, %v594_v29 }
 0x2b5   : > { %v602_v31 = vrot.slane %v595_v30, %v593_v23 }
 0x2b7   : > { %693 = vst.msk [vmem:[%s199_s23 + $0x4] ss:$8 sm:$0x3] %vm606_vm5, %v602_v31 }
 0x2b8 PF: > { %s14_s15 = sadd.s32 1, %s720_s15  }
 0x2b9   : > { %p11_p4 = scmp.ge.s32.totalorder %s14_s15, 4  }
 0x2bb   :  { %13 = sbr.rel (!%p11_p4) target bundleno = 1 (0x1), region = 67 }

</bundles_post_ra>
